<compile_context>
chip_gen: v7x
topology: tpu7x:2x2x1
jax: 0.10.0
libtpu: 0.0.40
codegen_flags: <defaults>
</compile_context>

<pallas_src>
import jax
import jax.numpy as jnp
from jax.experimental import pallas as pl
from jax.experimental.pallas import tpu as pltpu

EPS = 1e-10


def _round_up(x, m):
    return ((x + m - 1) // m) * m


# ---------------------------------------------------------------------------
# Plain-JAX re-implementations of the module's __init__-time precompute
# (these match the PyTorch reference exactly).
# ---------------------------------------------------------------------------
def phi(r, order):
    r = jnp.maximum(r, EPS)
    if order == 1:
        return jnp.sqrt(r)
    elif order == 2:
        return 0.5 * r * jnp.log(r)
    elif order == 4:
        return 0.5 * jnp.power(r, 2) * jnp.log(r)
    elif order % 2 == 0:
        return 0.5 * jnp.power(r, 0.5 * order) * jnp.log(r)
    else:
        return jnp.power(r, 0.5 * order)


def cross_sq_dist_mat(x, y):
    x_norm_sq = jnp.sum(x * x, axis=2)
    y_norm_sq = jnp.sum(y * y, axis=2)
    x_norm_sq_tile = x_norm_sq[:, :, None]
    y_norm_sq_tile = y_norm_sq[:, None, :]
    x_y_t = x @ jnp.swapaxes(y, 1, 2)
    return x_norm_sq_tile - 2.0 * x_y_t + y_norm_sq_tile


def pairwise_sq_dist_mat(x):
    x_x_t = x @ jnp.swapaxes(x, 1, 2)
    x_norm_sq = jnp.diagonal(x_x_t, axis1=1, axis2=2)
    x_norm_sq_tile = x_norm_sq[:, :, None]
    return x_norm_sq_tile - 2.0 * x_x_t + jnp.swapaxes(x_norm_sq_tile, 1, 2)


def solve_interpolation_precomputed(train_points, order, regularization_weight):
    b, n, d = train_points.shape
    c = train_points
    mat_a = phi(pairwise_sq_dist_mat(c), order)
    if regularization_weight > 0:
        eye = jnp.eye(n, dtype=train_points.dtype)[None]
        mat_a = mat_a + regularization_weight * eye
    ones = jnp.ones((b, n, 1), dtype=c.dtype)
    mat_b = jnp.concatenate([c, ones], axis=2)
    left = jnp.concatenate([mat_a, jnp.swapaxes(mat_b, 1, 2)], axis=1)
    n_b_cols = mat_b.shape[2]
    lhs_zeros = jnp.zeros((b, n_b_cols, n_b_cols), dtype=train_points.dtype)
    right = jnp.concatenate([mat_b, lhs_zeros], axis=1)
    lhs = jnp.concatenate([left, right], axis=2)
    return lhs


# ---------------------------------------------------------------------------
# Pallas kernel: tiled (M, P) @ (P, K) with P as the trailing reduction axis.
# ---------------------------------------------------------------------------
def _interp_matmul_kernel(phi_ref, w_ref, out_ref, acc_ref):
    k = pl.program_id(2)

    @pl.when(k == 0)
    def _():
        acc_ref[...] = jnp.zeros_like(acc_ref)

    acc_ref[...] += jnp.dot(
        phi_ref[...], w_ref[...], preferred_element_type=jnp.float32
    )

    @pl.when(k == pl.num_programs(2) - 1)
    def _():
        out_ref[...] = acc_ref[...].astype(out_ref.dtype)


def interp_apply_pallas(phi_padded, w_padded, tm, tn, tp):
    """phi_padded: (M_pad, P_pad) f32, w_padded: (P_pad, K_pad) f32.

    Caller guarantees M_pad % tm == 0, P_pad % tp == 0, K_pad % tn == 0,
    tn % 128 == 0, tp % 128 == 0, tm % 8 == 0.  Returns (M_pad, K_pad) f32.
    """
    M_pad, P_pad = phi_padded.shape
    P2, K_pad = w_padded.shape
    assert P_pad == P2
    assert M_pad % tm == 0 and P_pad % tp == 0 and K_pad % tn == 0

    grid = (M_pad // tm, K_pad // tn, P_pad // tp)

    # Size the scoped VMEM limit from the actual footprint: double-buffered
    # phi / w / out tiles plus the accumulator, with headroom, capped well
    # under v7x's 64 MiB physical VMEM.
    vmem_bytes = (2 * (tm * tp + tp * tn + tm * tn) + tm * tn) * 4
    vmem_limit = int(min(max(2 * vmem_bytes, 16 << 20), 48 << 20))

    return pl.pallas_call(
        _interp_matmul_kernel,
        out_shape=jax.ShapeDtypeStruct((M_pad, K_pad), phi_padded.dtype),
        grid_spec=pltpu.PrefetchScalarGridSpec(
            num_scalar_prefetch=0,
            grid=grid,
            in_specs=[
                pl.BlockSpec((tm, tp), lambda i, j, k: (i, k)),
                pl.BlockSpec((tp, tn), lambda i, j, k: (k, j)),
            ],
            out_specs=pl.BlockSpec((tm, tn), lambda i, j, k: (i, j)),
            scratch_shapes=[pltpu.VMEM((tm, tn), jnp.float32)],
        ),
        compiler_params=pltpu.CompilerParams(
            dimension_semantics=("parallel", "parallel", "arbitrary"),
            vmem_limit_bytes=vmem_limit,
        ),
    )(phi_padded, w_padded)


# ---------------------------------------------------------------------------
# Module equivalent
# ---------------------------------------------------------------------------
class InterpolateSpline:
    def __init__(self, train_points, query_points, order,
                 regularization_weight=0, tm=512, tn=256, tp=512):
        train_points = train_points[None]   # (1, n, d)
        query_points = query_points[None]   # (1, m, d)
        self.kernel = solve_interpolation_precomputed(
            train_points, order, regularization_weight
        )                                   # (1, n+d+1, n+d+1)
        self.train_values_pad = train_points.shape[2] + 1  # d + 1

        pairwise_dist = cross_sq_dist_mat(query_points, train_points)
        phi_pairwise_dist = phi(pairwise_dist, order)
        query_points_pad = jnp.pad(
            query_points, ((0, 0), (0, 0), (0, 1)), constant_values=1.0
        )
        self.phi_pairwise_query_points = jnp.concatenate(
            [phi_pairwise_dist, query_points_pad], axis=2
        )                                   # (1, m, n+d+1)

        # ------ tile sizing / zero-padding for the Pallas matmul -----------
        phi_2d = self.phi_pairwise_query_points[0]           # (M, P)
        self.M, self.P = phi_2d.shape
        self.tm = min(tm, _round_up(self.M, 8))               # sublane-aligned
        self.M_pad = _round_up(self.M, self.tm)
        self.tp = min(tp, _round_up(self.P, 128))              # lane-aligned
        self.P_pad = _round_up(self.P, self.tp)
        self.tn_cap = max(128, _round_up(tn, 128))
        # Zero-padded columns of phi multiply zero-padded rows of w -> exact.
        self.phi_padded = jnp.pad(
            phi_2d,
            ((0, self.M_pad - self.M), (0, self.P_pad - self.P)),
        )                                   # (M_pad, P_pad)

    def __call__(self, train_values):
        # train_values: (1, n, k)  ->  padded to (1, n+d+1, k)  (pad rows with 0)
        train_values_pad = jnp.pad(
            train_values, ((0, 0), (0, self.train_values_pad), (0, 0))
        )
        # TODO(synk): torch.solve (batched dense LU solve) has no Pallas
        # primitive; performed with jnp.linalg.solve as glue (tiny P x P system).
        w = jnp.linalg.solve(self.kernel, train_values_pad)[0]   # (P, K)
        K = w.shape[1]
        tn = min(self.tn_cap, _round_up(K, 128))   # lane-dense output stores
        K_pad = _round_up(K, tn)
        w_padded = jnp.pad(w, ((0, self.P_pad - self.P), (0, K_pad - K)))

        out_padded = interp_apply_pallas(
            self.phi_padded, w_padded, self.tm, tn, self.tp
        )                                   # (M_pad, K_pad)
        return out_padded[: self.M, :K][None]   # (1, m, k)


# ---------------------------------------------------------------------------
# Demo / self-check
# ---------------------------------------------------------------------------
if __name__ == "__main__":
    key = jax.random.PRNGKey(0)
    k_tp, k_qp, k_tv = jax.random.split(key, 3)

    n_train, n_query, dim, channels = 32, 64, 2, 4
    order = 2
    reg = 0.1

    train_points = jax.random.uniform(k_tp, (n_train, dim), dtype=jnp.float32)
    query_points = jax.random.uniform(k_qp, (n_query, dim), dtype=jnp.float32)
    train_values = jax.random.normal(k_tv, (1, n_train, channels), dtype=jnp.float32)

    module = InterpolateSpline(train_points, query_points, order, reg)
    out = module(train_values)
    out = jax.block_until_ready(out)

    # Pure-JAX reference for the forward pass (same math, no Pallas).
    tvp = jnp.pad(train_values, ((0, 0), (0, module.train_values_pad), (0, 0)))
    w_ref = jnp.linalg.solve(module.kernel, tvp)
    ref = jnp.einsum(
        "bmp,bpk->bmk", module.phi_pairwise_query_points, w_ref,
        precision=jax.lax.Precision.HIGHEST,
    )

    assert out.shape == (1, n_query, channels)
    assert jnp.allclose(out, ref, rtol=1e-4, atol=1e-4), "mismatch vs reference"

    print("KERNEL_OK")
</pallas_src>

<mosaic_0001>
module attributes {stable_mosaic.version = 11 : i64} {
  func.func @_interp_matmul_kernel(%arg0: i32, %arg1: i32, %arg2: i32, %arg3: memref<64x128xf32, #tpu.memory_space<vmem>>, %arg4: memref<128x128xf32, #tpu.memory_space<vmem>>, %arg5: memref<64x128xf32, #tpu.memory_space<vmem>>, %arg6: memref<64x128xf32, #tpu.memory_space<vmem>>) attributes {dimension_semantics = [#tpu.dimension_semantics<parallel>, #tpu.dimension_semantics<parallel>, #tpu.dimension_semantics<arbitrary>], iteration_bounds = array<i64: 1, 1, 1>, scalar_prefetch = 0 : i64, scratch_operands = 1 : i64, tpu.core_type = #tpu.core_type<tc>, window_params = [{transform_indices = @transform_0, window_bounds = array<i64: 64, 128>}, {transform_indices = @transform_1, window_bounds = array<i64: 128, 128>}, {transform_indices = @transform_2, window_bounds = array<i64: 64, 128>}]} {
    %c0_i32 = arith.constant 0 : i32
    %0 = arith.cmpi eq, %arg2, %c0_i32 : i32
    %1 = arith.extui %0 : i1 to i32
    %c0_i32_0 = arith.constant 0 : i32
    %2 = arith.cmpi ne, %1, %c0_i32_0 : i32
    scf.if %2 {
      %cst_10 = arith.constant 0.000000e+00 : f32
      %12 = vector.broadcast %cst_10 : f32 to vector<64x128xf32>
      %c0_11 = arith.constant 0 : index
      %c0_12 = arith.constant 0 : index
      %13 = vector.load %arg6[%c0_11, %c0_12] : memref<64x128xf32, #tpu.memory_space<vmem>>, vector<64x128xf32>
      tpu.vector_store %arg6[%c0_11, %c0_12], %12 {strides = array<i32>} : memref<64x128xf32, #tpu.memory_space<vmem>>, vector<64x128xf32>,
    } else {
    }
    %c0 = arith.constant 0 : index
    %c0_1 = arith.constant 0 : index
    %3 = vector.load %arg6[%c0, %c0_1] : memref<64x128xf32, #tpu.memory_space<vmem>>, vector<64x128xf32>
    %c0_2 = arith.constant 0 : index
    %c0_3 = arith.constant 0 : index
    %4 = vector.load %arg3[%c0_2, %c0_3] : memref<64x128xf32, #tpu.memory_space<vmem>>, vector<64x128xf32>
    %c0_4 = arith.constant 0 : index
    %c0_5 = arith.constant 0 : index
    %5 = vector.load %arg4[%c0_4, %c0_5] : memref<128x128xf32, #tpu.memory_space<vmem>>, vector<128x128xf32>
    %cst = arith.constant dense<0.000000e+00> : vector<64x128xf32>
    %6 = tpu.matmul %4, %5, %cst {dimension_numbers = #tpu.dot_dimension_numbers<[1], [0], [0], [1], [0, 0, 1, 1], [], []>} : vector<64x128xf32>, vector<128x128xf32>, vector<64x128xf32> -> vector<64x128xf32>
    %7 = arith.addf %3, %6 : vector<64x128xf32>
    %c0_6 = arith.constant 0 : index
    %c0_7 = arith.constant 0 : index
    %8 = vector.load %arg6[%c0_6, %c0_7] : memref<64x128xf32, #tpu.memory_space<vmem>>, vector<64x128xf32>
    tpu.vector_store %arg6[%c0_6, %c0_7], %7 {strides = array<i32>} : memref<64x128xf32, #tpu.memory_space<vmem>>, vector<64x128xf32>,
    %c0_i32_8 = arith.constant 0 : i32
    %9 = arith.cmpi eq, %arg2, %c0_i32_8 : i32
    %10 = arith.extui %9 : i1 to i32
    %c0_i32_9 = arith.constant 0 : i32
    %11 = arith.cmpi ne, %10, %c0_i32_9 : i32
    scf.if %11 {
      %c0_10 = arith.constant 0 : index
      %c0_11 = arith.constant 0 : index
      %12 = vector.load %arg6[%c0_10, %c0_11] : memref<64x128xf32, #tpu.memory_space<vmem>>, vector<64x128xf32>
      %c0_12 = arith.constant 0 : index
      %c0_13 = arith.constant 0 : index
      %13 = vector.load %arg5[%c0_12, %c0_13] : memref<64x128xf32, #tpu.memory_space<vmem>>, vector<64x128xf32>
      tpu.vector_store %arg5[%c0_12, %c0_13], %12 {strides = array<i32>} : memref<64x128xf32, #tpu.memory_space<vmem>>, vector<64x128xf32>,
    } else {
    }
    return
  }
  func.func @transform_0(%arg0: i32, %arg1: i32, %arg2: i32) -> (i32, i32) {
    %c0_i32 = arith.constant 0 : i32
    return %arg0, %arg2 : i32, i32
  }
  func.func @transform_1(%arg0: i32, %arg1: i32, %arg2: i32) -> (i32, i32) {
    %c0_i32 = arith.constant 0 : i32
    return %arg2, %arg1 : i32, i32
  }
  func.func @transform_2(%arg0: i32, %arg1: i32, %arg2: i32) -> (i32, i32) {
    %c0_i32 = arith.constant 0 : i32
    return %arg0, %arg1 : i32, i32
  }
}

</mosaic_0001>

<bundles_post_ra>
// kernel: tpu_custom_call.1
= control target key start
LH: loop header
LB: loop body
LE: loop exit
PB: predicated region body
PF: predicated region fallthrough
CT: control target
= control target key end

     0   :  { %7 = vsyncpa [#allocation4], 0  ;;  %s500_s0 = inlined_call_operand.hbm [shape: f32[64,128], index: 0, kind: input, shape index: {}]   ;;  %s501_s1 = inlined_call_operand.hbm [shape: f32[128,128], index: 1, kind: input, shape index: {}]   ;;  %s502_s2 = inlined_call_operand.hbm [shape: f32[64,128], index: 2, kind: output, shape index: {}]  }
   0x1   :  { %8 = vsyncpa [#allocation7], 0 }
   0x2   :  { %9 = vsyncpa [#allocation5], 0  ;;  %s435_s9 = smov [#allocation3]   ;;  %s363_s13 = scalar_lea.hbm %s500_s0, 1024 }
   0x3   :  { %s15_s10 = sshll.u32 %s435_s9, 4  ;;  %p364_p0 = scmp.ne.s32.totalorder %s500_s0, %s363_s13  ;;  %s16_s10 = int_to_ptr.vmem [resolvable:$true] %s15_s10 }
   0x4   :  { %p367_p1 = scmp.lt.u32.totalorder %s363_s13, %s500_s0 }
   0x6   :  { %p369_p2 = pnand %p367_p1, %p364_p0 }
   0x8   :  { %372 = shalt.err (!%p369_p2)
}
   0x9   :  { %s373_s18 = scalar_lea.vmem %s16_s10, 1024  ;;  %p378_p4 = scmp.lt.s32.totalorder %s16_s10, %s16_s10 }
   0xa   :  { %p374_p3 = scmp.ne.s32.totalorder %s16_s10, %s373_s18  ;;  %p379_p5 = scmp.lt.s32.totalorder %s373_s18, %s373_s18 }
   0xc   :  { %p380_p6 = por %p379_p5, %p378_p4 }
   0xe   :  { %p381_p7 = pnand %p380_p6, %p374_p3 }
  0x10   :  { %384 = shalt.err (!%p381_p7)
}
  0x11   :  { %s436_s19 = smov 128   ;;  %s437_s20 = smov 8  }
  0x12   :  { %21 = dma.hbm_to_vmem [thread:$0]  %s500_s0, 1024, %s16_s10, [#allocation4], %s436_s19, %s436_s19, %s437_s20  }
  0x13   :  { %s438_s23 = smov [#allocation6]   ;;  %s385_s27 = scalar_lea.hbm %s501_s1, 2048 }
  0x14   :  { %s27_s24 = sshll.u32 %s438_s23, 4  ;;  %p386_p8 = scmp.ne.s32.totalorder %s501_s1, %s385_s27  ;;  %s28_s24 = int_to_ptr.vmem [resolvable:$true] %s27_s24 }
  0x15   :  { %p389_p9 = scmp.lt.u32.totalorder %s385_s27, %s501_s1 }
  0x17   :  { %p391_p10 = pnand %p389_p9, %p386_p8 }
  0x19   :  { %394 = shalt.err (!%p391_p10)
}
  0x1a   :  { %s395_s4 = scalar_lea.vmem %s28_s24, 2048  ;;  %p400_p12 = scmp.lt.s32.totalorder %s28_s24, %s28_s24 }
  0x1b   :  { %p396_p11 = scmp.ne.s32.totalorder %s28_s24, %s395_s4  ;;  %p401_p13 = scmp.lt.s32.totalorder %s395_s4, %s395_s4 }
  0x1d   :  { %p402_p0 = por %p401_p13, %p400_p12 }
  0x1f   :  { %p403_p1 = pnand %p402_p0, %p396_p11 }
  0x21   :  { %406 = shalt.err (!%p403_p1)
}
  0x22   :  { %33 = dma.hbm_to_vmem [thread:$0]  %s501_s1, 2048, %s28_s24, [#allocation7], %s436_s19, %s436_s19, %s437_s20  }
  0x23   :  { %429 = dma.done.wait [#allocation4], 1024  }
  0x24   :  { %430 = vsyncadd [#allocation4], 4294966272 }
  0x25   :  { %431 = dma.done.wait [#allocation7], 2048  }
  0x26   :  { %432 = vsyncadd [#allocation7], 4294965248  ;;  %v68_v0 = vld [vmem:[#allocation6] sm:$0xff]  ;;  %v69_v1 = vld [vmem:[#allocation6 + $0x8] sm:$0xff]  ;;  %s439_s1 = smov [#allocation8]  }
  0x27   :  { %v70_v2 = vld [vmem:[#allocation6 + $0x10] sm:$0xff]  ;;  %v310_v3 = vpack.c.bf16 %v69_v1, %v68_v0  ;;  %v71_v4 = vld [vmem:[#allocation6 + $0x18] sm:$0xff]  ;;  %v72_v6 = vld [vmem:[#allocation6 + $0x20] sm:$0xff]  ;;  %s229_s6 = sshll.u32 %s439_s1, 4  ;;  %s230_s6 = int_to_ptr.vmem [resolvable:$true] %s229_s6 }
  0x28   :  { %v314_v5 = vpack.c.bf16 %v71_v4, %v70_v2  ;;  %v73_v7 = vld [vmem:[#allocation6 + $0x28] sm:$0xff]  ;;  %v60_v9 = vld [vmem:[#allocation3] sm:$0xff]  ;;  %v74_v11 = vld [vmem:[#allocation6 + $0x30] sm:$0xff]  ;;  %s407_s7 = scalar_lea.vmem %s230_s6, 1024  ;;  %p412_p3 = scmp.lt.s32.totalorder %s230_s6, %s230_s6 }
  0x29   :  { %311 = vmatprep.subr.bf16.mxu0 %v310_v3  ;;  %342 = vmatprep.subr.bf16.mxu1 %v310_v3  ;;  %v318_v8 = vpack.c.bf16 %v73_v7, %v72_v6  ;;  %v64_v10 = vld [vmem:[#allocation3 + $0x20] sm:$0xff]  ;;  %v75_v12 = vld [vmem:[#allocation6 + $0x38] sm:$0xff]  ;;  %v77_v15 = vld [vmem:[#allocation6 + $0x48] sm:$0xff]  ;;  %p408_p2 = scmp.ne.s32.totalorder %s230_s6, %s407_s7  ;;  %p413_p4 = scmp.lt.s32.totalorder %s407_s7, %s407_s7 }
  0x2a   :  { %313 = vmatpush3.bf16.msra.mxu0 %v310_v3  ;;  %350 = vmatpush3.bf16.msra.mxu1 %v310_v3  ;;  %v322_v13 = vpack.c.bf16 %v75_v12, %v74_v11  ;;  %v76_v14 = vld [vmem:[#allocation6 + $0x40] sm:$0xff]  ;;  %v78_v17 = vld [vmem:[#allocation6 + $0x50] sm:$0xff]  ;;  %v79_v18 = vld [vmem:[#allocation6 + $0x58] sm:$0xff] }
  0x2b   :  { %315 = vmatprep.subr.bf16.mxu0 %v314_v5  ;;  %343 = vmatprep.subr.bf16.mxu1 %v314_v5  ;;  %v326_v16 = vpack.c.bf16 %v77_v15, %v76_v14  ;;  %v330_v19 = vpack.c.bf16 %v79_v18, %v78_v17  ;;  %v80_v20 = vld [vmem:[#allocation6 + $0x60] sm:$0xff]  ;;  %v81_v21 = vld [vmem:[#allocation6 + $0x68] sm:$0xff]  ;;  %v82_v23 = vld [vmem:[#allocation6 + $0x70] sm:$0xff]  ;;  %p414_p5 = por %p413_p4, %p412_p3 }
  0x2c   :  { %298 = vmatprep.mubr.f32.mxu0 %v60_v9  ;;  %304 = vmatprep.mubr.f32.mxu1 %v64_v10  ;;  %v334_v22 = vpack.c.bf16 %v81_v21, %v80_v20  ;;  %v83_v24 = vld [vmem:[#allocation6 + $0x78] sm:$0xff]  ;;  %v61_v26 = vld [vmem:[#allocation3 + $0x8] sm:$0xff]  ;;  %v62_v28 = vld [vmem:[#allocation3 + $0x10] sm:$0xff] }
  0x2d   :  { %v338_v25 = vpack.c.bf16 %v83_v24, %v82_v23  ;;  %v65_v27 = vld [vmem:[#allocation3 + $0x28] sm:$0xff]  ;;  %v66_v29 = vld [vmem:[#allocation3 + $0x30] sm:$0xff]  ;;  %v63_v30 = vld [vmem:[#allocation3 + $0x18] sm:$0xff]  ;;  %p415_p6 = pnand %p414_p5, %p408_p2 }
  0x2e   :  { %317 = vmatpush3.bf16.msra.mxu0 %v314_v5  ;;  %351 = vmatpush3.bf16.msra.mxu1 %v314_v5  ;;  %v67_v31 = vld [vmem:[#allocation3 + $0x38] sm:$0xff] }
  0x2f   :  { %319 = vmatprep.subr.bf16.mxu0 %v318_v8  ;;  %344 = vmatprep.subr.bf16.mxu1 %v318_v8 }
  0x32   :  { %321 = vmatpush3.bf16.msra.mxu0 %v318_v8  ;;  %352 = vmatpush3.bf16.msra.mxu1 %v318_v8 }
  0x33   :  { %323 = vmatprep.subr.bf16.mxu0 %v322_v13  ;;  %345 = vmatprep.subr.bf16.mxu1 %v322_v13 }
  0x36   :  { %325 = vmatpush3.bf16.msra.mxu0 %v322_v13  ;;  %353 = vmatpush3.bf16.msra.mxu1 %v322_v13 }
  0x37   :  { %327 = vmatprep.subr.bf16.mxu0 %v326_v16  ;;  %346 = vmatprep.subr.bf16.mxu1 %v326_v16 }
  0x3a   :  { %329 = vmatpush3.bf16.msra.mxu0 %v326_v16  ;;  %354 = vmatpush3.bf16.msra.mxu1 %v326_v16 }
  0x3b   :  { %331 = vmatprep.subr.bf16.mxu0 %v330_v19  ;;  %347 = vmatprep.subr.bf16.mxu1 %v330_v19 }
  0x3e   :  { %333 = vmatpush3.bf16.msra.mxu0 %v330_v19  ;;  %355 = vmatpush3.bf16.msra.mxu1 %v330_v19 }
  0x3f   :  { %335 = vmatprep.subr.bf16.mxu0 %v334_v22  ;;  %348 = vmatprep.subr.bf16.mxu1 %v334_v22 }
  0x42   :  { %337 = vmatpush3.bf16.msra.mxu0 %v334_v22  ;;  %356 = vmatpush3.bf16.msra.mxu1 %v334_v22 }
  0x43   :  { %339 = vmatprep.subr.bf16.mxu0 %v338_v25  ;;  %349 = vmatprep.subr.bf16.mxu1 %v338_v25 }
  0x46   :  { %341 = vmatpush3.bf16.msra.mxu0 %v338_v25  ;;  %357 = vmatpush3.bf16.msra.mxu1 %v338_v25 }
  0x49   :  { %299 = vmatmul.mubr.f32.vlgmr.msra.gmra.mrb[0].mxu0 %v61_v26  ;;  %305 = vmatmul.mubr.f32.vlgmr.msra.gmra.mrb[0].mxu1 %v65_v27 }
  0x4a   :  { %301 = vmatprep.mubr.f32.mxu0 %v62_v28  ;;  %307 = vmatprep.mubr.f32.mxu1 %v66_v29 }
  0x4d   :  { %302 = vmatmul.mubr.f32.gmra.mrb[2].mxu0 %v63_v30  ;;  %308 = vmatmul.mubr.f32.gmra.mrb[2].mxu1 %v67_v31 }
 0x11c   :  { %v300_v32 = vpop.f32.mrb[0].mxu0  ;;  %v306_v33 = vpop.f32.mrb[0].mxu1 }
 0x11d   :  { %217 = vst [vmem:[#allocation8 + $0x8] sm:$0xff] %v300_v32  ;;  %221 = vst [vmem:[#allocation8 + $0x28] sm:$0xff] %v306_v33  ;;  %v150_v34 = vpop.f32.mrb[1].mxu0  ;;  %v170_v35 = vpop.f32.mrb[1].mxu1 }
 0x11e   :  { %216 = vst [vmem:[#allocation8] sm:$0xff] %v150_v34  ;;  %220 = vst [vmem:[#allocation8 + $0x20] sm:$0xff] %v170_v35 }
 0x120   :  { %v303_v36 = vpop.f32.mrb[2].mxu0  ;;  %v309_v37 = vpop.f32.mrb[2].mxu1 }
 0x121   :  { %219 = vst [vmem:[#allocation8 + $0x18] sm:$0xff] %v303_v36  ;;  %223 = vst [vmem:[#allocation8 + $0x38] sm:$0xff] %v309_v37  ;;  %v160_v38 = vpop.f32.mrb[3].mxu0  ;;  %v180_v39 = vpop.f32.mrb[3].mxu1 }
 0x122   :  { %218 = vst [vmem:[#allocation8 + $0x10] sm:$0xff] %v160_v38  ;;  %222 = vst [vmem:[#allocation8 + $0x30] sm:$0xff] %v180_v39 }
 0x123   :  { %418 = shalt.err (!%p415_p6)
}
 0x124   :  { %s419_s10 = scalar_lea.hbm %s502_s2, 1024 }
 0x125   :  { %p420_p7 = scmp.ne.s32.totalorder %s502_s2, %s419_s10  ;;  %p423_p8 = scmp.lt.u32.totalorder %s419_s10, %s502_s2 }
 0x127   :  { %p425_p9 = pnand %p423_p8, %p420_p7 }
 0x129   :  { %428 = shalt.err (!%p425_p9)
}
 0x12a   :  { %235 = dma.vmem_to_hbm [thread:$0]  %s230_s6, 1024, %s502_s2, [#allocation5], %s436_s19, %s436_s19, %s437_s20  }
 0x12b   :  { %433 = dma.done.wait [#allocation5], 1024  }
 0x12c   :  { %434 = vsyncadd [#allocation5], 4294966272 }
 0x12d   :  { %239 = vsyncpa [#allocation4], 1 }
 0x12e   :  { %240 = vsyncpa [#allocation7], 1 }
 0x12f   :  { %241 = vsyncpa [#allocation5], 1 }

</bundles_post_ra>
